<compile_context>
chip_gen: v6e
topology: v6e:2x2x1
jax: 0.10.0
libtpu: 0.0.40
codegen_flags: <defaults>
</compile_context>

<pallas_src>
import functools

import jax
import jax.numpy as jnp
from jax.experimental import pallas as pl
from jax.experimental.pallas import tpu as pltpu

EPS = 1e-5
_MIB = 1024 * 1024


# ----------------------------- kernels --------------------------------------

def _normalize(x):
    mean = jnp.mean(x, axis=-1, keepdims=True)
    xc = x - mean
    var = jnp.mean(xc * xc, axis=-1, keepdims=True)  # biased var (matches F.layer_norm)
    return xc * jax.lax.rsqrt(var + EPS)


def _ln_kernel(x_ref, w_ref, b_ref, o_ref):
    y = _normalize(x_ref[...].astype(jnp.float32)) * w_ref[...].astype(jnp.float32)
    o_ref[...] = (y + b_ref[...].astype(jnp.float32)).astype(o_ref.dtype)


def _ln_kernel_nobias(x_ref, w_ref, o_ref):
    y = _normalize(x_ref[...].astype(jnp.float32)) * w_ref[...].astype(jnp.float32)
    o_ref[...] = y.astype(o_ref.dtype)


def _normalize_packed(x, pool):
    # pool: (128, 128) block-diagonal averaging matrix (1/D inside each DxD
    # diagonal block). x @ pool broadcasts each segment's mean back over the
    # segment's lanes; HIGHEST precision keeps f32 accuracy on the MXU.
    mean = jnp.dot(x, pool, preferred_element_type=jnp.float32,
                   precision=jax.lax.Precision.HIGHEST)
    xc = x - mean
    var = jnp.dot(xc * xc, pool, preferred_element_type=jnp.float32,
                  precision=jax.lax.Precision.HIGHEST)
    return xc * jax.lax.rsqrt(var + EPS)


def _ln_packed_kernel(x_ref, p_ref, w_ref, b_ref, o_ref):
    y = _normalize_packed(x_ref[...].astype(jnp.float32), p_ref[...])
    y = y * w_ref[...].astype(jnp.float32) + b_ref[...].astype(jnp.float32)
    o_ref[...] = y.astype(o_ref.dtype)


def _ln_packed_kernel_nobias(x_ref, p_ref, w_ref, o_ref):
    y = _normalize_packed(x_ref[...].astype(jnp.float32), p_ref[...])
    o_ref[...] = (y * w_ref[...].astype(jnp.float32)).astype(o_ref.dtype)


# --------------------------- tiling heuristics -------------------------------

def _sublane(dtype):
    # Sublane packing: 8 for 4-byte, 16 for 2-byte, 32 for 1-byte dtypes.
    return max(8, 32 // max(jnp.dtype(dtype).itemsize, 1))


def _round_up(v, m):
    return ((v + m - 1) // m) * m


def _chip_params():
    """Returns (per-core VMEM capacity bytes, has two TensorCores, block byte target)."""
    kind = ""
    try:
        kind = (jax.devices()[0].device_kind or "").lower()
    except Exception:
        pass
    is_v7 = ("v7" in kind) or ("tpu7" in kind)
    two_cores = is_v7 or ("v4" in kind) or ("v5p" in kind)

    vmem_cap = None
    try:
        vmem_cap = int(pltpu.get_tpu_info().vmem_capacity_bytes)
    except Exception:
        vmem_cap = None
    if vmem_cap is None or vmem_cap <= 0:
        vmem_cap = 64 * _MIB if is_v7 else 128 * _MIB
    if is_v7:
        vmem_cap = min(vmem_cap, 64 * _MIB)  # 64 MiB per TensorCore on v7x

    # Bigger blocks where VMEM is plentiful (v5e/v6e: 128 MiB), smaller on v7x.
    target_bytes = 2 * _MIB if vmem_cap <= 80 * _MIB else 4 * _MIB
    return vmem_cap, two_cores, target_bytes


def _choose_tile_rows(rows, lanes, dtype, *, target_bytes, two_cores):
    sub = _sublane(dtype)
    itemsize = jnp.dtype(dtype).itemsize
    rows_up = _round_up(max(rows, 1), sub)
    row_bytes = max(lanes * itemsize, 1)

    tile = (target_bytes // row_bytes) // sub * sub
    tile = max(sub, min(tile, 8192, rows_up))

    if two_cores:
        # >= 2 pipelined steps per TensorCore (4 total) so each core overlaps
        # DMA with compute; round the step count to even for load balance.
        while pl.cdiv(rows, tile) < 4 and tile > sub:
            tile = max(sub, ((tile // 2) // sub) * sub)
        steps = pl.cdiv(rows, tile)
        if steps > 1 and steps % 2 == 1:
            cand = max(sub, _round_up(pl.cdiv(rows, steps + 1), sub))
            if cand <= tile and pl.cdiv(rows, cand) % 2 == 0:
                tile = cand
    # On single-TC v5e/v6e the grid is a serial loop: keep one full-size tile.
    return tile


def _vmem_limit_bytes(tile, lanes, in_dtype, out_dtype, vmem_cap, *, n_in_buffers):
    in_b = tile * lanes * jnp.dtype(in_dtype).itemsize
    out_b = tile * lanes * jnp.dtype(out_dtype).itemsize
    f32_b = tile * lanes * 4
    # pipelined x buffers + double-buffered out + f32 intermediates + params/pool
    est = n_in_buffers * in_b + 2 * out_b + 4 * f32_b + 2 * 128 * 128 * 4 + 8 * lanes * 4
    lo = 32 * _MIB
    hi = max(lo, min(vmem_cap - 16 * _MIB, (3 * vmem_cap) // 4))  # 48 MiB v7x, 96 MiB v5e/v6e
    return int(min(max(est, lo), hi))


def _pooling_matrix(d, k):
    # (k*d, k*d) block-diagonal averaging matrix: P[i, j] = 1/d iff i//d == j//d.
    n = k * d
    seg = jnp.arange(n, dtype=jnp.int32) // d
    return jnp.where(seg[:, None] == seg[None, :], 1.0 / d, 0.0).astype(jnp.float32)


# ------------------------------- wrapper -------------------------------------

@functools.partial(jax.jit, static_argnames=("tile_rows",))
def layer_norm(x, weight, bias=None, *, tile_rows=None):
    """LayerNorm over the last dim of x with optional bias (eps=1e-5)."""
    orig_shape = x.shape
    D = orig_shape[-1]
    rows = 1
    for s in orig_shape[:-1]:
        rows *= s
    x2 = x.reshape(rows, D)

    vmem_cap, two_cores, target_bytes = _chip_params()

    # Lane-dense packing for narrow features: pack k = 128 // D rows per
    # 128-lane row so loads/stores use all lanes instead of masked vst.msk.
    k = 128 // D if (0 < D < 128 and 128 % D == 0) else 1
    packed = k > 1 and rows % k == 0

    if packed:
        lanes = k * D
        rows_eff = rows // k
    else:
        lanes = D
        rows_eff = rows

    tile = tile_rows if tile_rows is not None else _choose_tile_rows(
        rows_eff, lanes, x.dtype, target_bytes=target_bytes, two_cores=two_cores)
    grid_steps = pl.cdiv(rows_eff, tile)
    grid = (grid_steps,)

    use_deep_pipeline = grid_steps >= 3  # third input buffer hides DMA jitter
    if use_deep_pipeline:
        x_spec = pl.BlockSpec((tile, lanes), lambda i: (i, 0),
                              pipeline_mode=pl.Buffered(3))
    else:
        x_spec = pl.BlockSpec((tile, lanes), lambda i: (i, 0))
    o_spec = pl.BlockSpec((tile, lanes), lambda i: (i, 0))
    # weight/bias/pool never change across the grid: keep them whole in VMEM.
    vmem_whole = pl.BlockSpec(memory_space=pltpu.MemorySpace.VMEM)

    compiler_params = pltpu.CompilerParams(
        dimension_semantics=("parallel",),
        vmem_limit_bytes=_vmem_limit_bytes(
            tile, lanes, x.dtype, x.dtype, vmem_cap,
            n_in_buffers=3 if use_deep_pipeline else 2),
    )

    if packed:
        x_in = x2.reshape(rows_eff, lanes)
        w_in = jnp.tile(weight.reshape(-1), k).reshape(1, lanes)
        pool = _pooling_matrix(D, k)
        if bias is None:
            kernel = _ln_packed_kernel_nobias
            operands = (x_in, pool, w_in)
        else:
            kernel = _ln_packed_kernel
            operands = (x_in, pool, w_in, jnp.tile(bias.reshape(-1), k).reshape(1, lanes))
    else:
        w_in = weight.reshape(1, D)
        if bias is None:
            kernel = _ln_kernel_nobias
            operands = (x2, w_in)
        else:
            kernel = _ln_kernel
            operands = (x2, w_in, bias.reshape(1, D))

    in_specs = [x_spec] + [vmem_whole] * (len(operands) - 1)

    out = pl.pallas_call(
        kernel,
        out_shape=jax.ShapeDtypeStruct((rows_eff, lanes), x.dtype),
        grid_spec=pltpu.PrefetchScalarGridSpec(
            num_scalar_prefetch=0,
            grid=grid,
            in_specs=in_specs,
            out_specs=o_spec,
        ),
        compiler_params=compiler_params,
    )(*operands)

    return out.reshape(orig_shape)


def _reference_layer_norm(x, w, b):
    mean = jnp.mean(x, axis=-1, keepdims=True)
    var = jnp.mean((x - mean) ** 2, axis=-1, keepdims=True)
    y = (x - mean) / jnp.sqrt(var + EPS) * w
    return y + b if b is not None else y


if __name__ == "__main__":
    key = jax.random.PRNGKey(0)
    kx1, kw1, kb1, kx2, kx3, kw3, kb3, kx4, kw4 = jax.random.split(key, 9)

    # Case 1: bias=True, D=32 (< 128) -> lane-dense packed path (k=4).
    x1 = jax.random.normal(kx1, (2, 8, 32), dtype=jnp.float32)
    w1 = 1.0 + 0.1 * jax.random.normal(kw1, (32,), dtype=jnp.float32)
    b1 = 0.1 * jax.random.normal(kb1, (32,), dtype=jnp.float32)
    y1 = jax.block_until_ready(layer_norm(x1, w1, b1))
    r1 = _reference_layer_norm(x1, w1, b1)
    assert y1.shape == x1.shape and y1.dtype == x1.dtype
    assert float(jnp.max(jnp.abs(y1 - r1))) < 1e-5

    # Case 2: bias=False, ragged rows (3*5=15, not divisible by k) -> standard path.
    x2 = jax.random.normal(kx2, (3, 5, 32), dtype=jnp.float32)
    w2 = jnp.ones((32,), dtype=jnp.float32)
    y2 = jax.block_until_ready(layer_norm(x2, w2, None))
    r2 = _reference_layer_norm(x2, w2, None)
    assert y2.shape == x2.shape and y2.dtype == x2.dtype
    assert float(jnp.max(jnp.abs(y2 - r2))) < 1e-5

    # Case 3: D=128 (already lane-dense), forced 4-step grid -> Buffered(3) pipeline.
    x3 = jax.random.normal(kx3, (4, 8, 128), dtype=jnp.float32)
    w3 = 1.0 + 0.1 * jax.random.normal(kw3, (128,), dtype=jnp.float32)
    b3 = 0.1 * jax.random.normal(kb3, (128,), dtype=jnp.float32)
    y3 = jax.block_until_ready(layer_norm(x3, w3, b3, tile_rows=8))
    r3 = _reference_layer_norm(x3, w3, b3)
    assert y3.shape == x3.shape and y3.dtype == x3.dtype
    assert float(jnp.max(jnp.abs(y3 - r3))) < 1e-5

    # Case 4: bias=False, D=64 -> packed no-bias path (k=2).
    x4 = jax.random.normal(kx4, (2, 8, 64), dtype=jnp.float32)
    w4 = 1.0 + 0.1 * jax.random.normal(kw4, (64,), dtype=jnp.float32)
    y4 = jax.block_until_ready(layer_norm(x4, w4, None))
    r4 = _reference_layer_norm(x4, w4, None)
    assert y4.shape == x4.shape and y4.dtype == x4.dtype
    assert float(jnp.max(jnp.abs(y4 - r4))) < 1e-5

    print("KERNEL_OK")
</pallas_src>

<mosaic_0001>
module attributes {stable_mosaic.version = 11 : i64} {
  func.func @_ln_packed_kernel(%arg0: i32, %arg1: memref<8x128xf32, #tpu.memory_space<vmem>>, %arg2: memref<128x128xf32, #tpu.memory_space<vmem>>, %arg3: memref<1x128xf32, #tpu.memory_space<vmem>>, %arg4: memref<1x128xf32, #tpu.memory_space<vmem>>, %arg5: memref<8x128xf32, #tpu.memory_space<vmem>>) attributes {dimension_semantics = [#tpu.dimension_semantics<parallel>], iteration_bounds = array<i64: 1>, scalar_prefetch = 0 : i64, scratch_operands = 0 : i64, tpu.core_type = #tpu.core_type<tc>, window_params = [{transform_indices = @transform_0, window_bounds = array<i64: 8, 128>}, {pipeline_mode = #tpu.pipeline_mode<synchronous>, transform_indices = @transform_1, window_bounds = array<i64: 128, 128>}, {pipeline_mode = #tpu.pipeline_mode<synchronous>, transform_indices = @transform_2, window_bounds = array<i64: 1, 128>}, {pipeline_mode = #tpu.pipeline_mode<synchronous>, transform_indices = @transform_3, window_bounds = array<i64: 1, 128>}, {transform_indices = @transform_4, window_bounds = array<i64: 8, 128>}]} {
    %c0 = arith.constant 0 : index
    %c0_0 = arith.constant 0 : index
    %0 = vector.load %arg1[%c0, %c0_0] : memref<8x128xf32, #tpu.memory_space<vmem>>, vector<8x128xf32>
    %c0_1 = arith.constant 0 : index
    %c0_2 = arith.constant 0 : index
    %1 = vector.load %arg2[%c0_1, %c0_2] : memref<128x128xf32, #tpu.memory_space<vmem>>, vector<128x128xf32>
    %cst = arith.constant dense<0.000000e+00> : vector<8x128xf32>
    %2 = tpu.matmul %0, %1, %cst {dimension_numbers = #tpu.dot_dimension_numbers<[1], [0], [0], [1], [0, 0, 1, 1], [], []>, precision = #tpu.contract_precision<fp32>} : vector<8x128xf32>, vector<128x128xf32>, vector<8x128xf32> -> vector<8x128xf32>
    %3 = arith.subf %0, %2 : vector<8x128xf32>
    %4 = arith.mulf %3, %3 : vector<8x128xf32>
    %cst_3 = arith.constant dense<0.000000e+00> : vector<8x128xf32>
    %5 = tpu.matmul %4, %1, %cst_3 {dimension_numbers = #tpu.dot_dimension_numbers<[1], [0], [0], [1], [0, 0, 1, 1], [], []>, precision = #tpu.contract_precision<fp32>} : vector<8x128xf32>, vector<128x128xf32>, vector<8x128xf32> -> vector<8x128xf32>
    %cst_4 = arith.constant 9.99999974E-6 : f32
    %6 = vector.broadcast %cst_4 : f32 to vector<8x128xf32>
    %7 = arith.addf %5, %6 : vector<8x128xf32>
    %8 = math.rsqrt %7 : vector<8x128xf32>
    %9 = arith.mulf %3, %8 : vector<8x128xf32>
    %c0_5 = arith.constant 0 : index
    %c0_6 = arith.constant 0 : index
    %10 = vector.load %arg3[%c0_5, %c0_6] : memref<1x128xf32, #tpu.memory_space<vmem>>, vector<1x128xf32>
    %11 = vector.broadcast %10 : vector<1x128xf32> to vector<8x128xf32>
    %12 = arith.mulf %9, %11 : vector<8x128xf32>
    %c0_7 = arith.constant 0 : index
    %c0_8 = arith.constant 0 : index
    %13 = vector.load %arg4[%c0_7, %c0_8] : memref<1x128xf32, #tpu.memory_space<vmem>>, vector<1x128xf32>
    %14 = vector.broadcast %13 : vector<1x128xf32> to vector<8x128xf32>
    %15 = arith.addf %12, %14 : vector<8x128xf32>
    %c0_9 = arith.constant 0 : index
    %c0_10 = arith.constant 0 : index
    %16 = vector.load %arg5[%c0_9, %c0_10] : memref<8x128xf32, #tpu.memory_space<vmem>>, vector<8x128xf32>
    tpu.vector_store %arg5[%c0_9, %c0_10], %15 {strides = array<i32>} : memref<8x128xf32, #tpu.memory_space<vmem>>, vector<8x128xf32>,
    return
  }
  func.func @transform_0(%arg0: i32) -> (i32, i32) {
    %c0_i32 = arith.constant 0 : i32
    %c0_i32_0 = arith.constant 0 : i32
    return %arg0, %c0_i32 : i32, i32
  }
  func.func @transform_1(%arg0: i32) -> (i32, i32) {
    %c0_i32 = arith.constant 0 : i32
    %c0_i32_0 = arith.constant 0 : i32
    %c0_i32_1 = arith.constant 0 : i32
    return %c0_i32, %c0_i32_0 : i32, i32
  }
  func.func @transform_2(%arg0: i32) -> (i32, i32) {
    %c0_i32 = arith.constant 0 : i32
    %c0_i32_0 = arith.constant 0 : i32
    %c0_i32_1 = arith.constant 0 : i32
    return %c0_i32, %c0_i32_0 : i32, i32
  }
  func.func @transform_3(%arg0: i32) -> (i32, i32) {
    %c0_i32 = arith.constant 0 : i32
    %c0_i32_0 = arith.constant 0 : i32
    %c0_i32_1 = arith.constant 0 : i32
    return %c0_i32, %c0_i32_0 : i32, i32
  }
  func.func @transform_4(%arg0: i32) -> (i32, i32) {
    %c0_i32 = arith.constant 0 : i32
    %c0_i32_0 = arith.constant 0 : i32
    return %arg0, %c0_i32 : i32, i32
  }
}

</mosaic_0001>

<bundles_post_ra>
// kernel: tile.14
= control target key start
LH: loop header
LB: loop body
LE: loop exit
PB: predicated region body
PF: predicated region fallthrough
CT: control target
= control target key end

     0   :  { %vm8_vm0 = vcmask 261120   ;;  %s40_s8 = smov 32   ;;  %s41_s9 = smov 64   ;;  %vm14_vm1 = vcmask 1048320   ;;  %vm20_vm2 = vcmask 785920   ;;  %vm26_vm3 = vcmask 523520   ;;  %s58_s0 = inlined_call_operand.vmem [shape: f32[4,32], index: 0, kind: input, shape index: {}]   ;;  %s59_s1 = inlined_call_operand.vmem [shape: f32[1,128], index: 1, kind: output, shape index: {}]  }
   0x1   :  { %v5_v0 = vld [vmem:[%s58_s0] sm:$0xf]  ;;  %s39_s0 = smov 96  }
   0x2   :  { %6 = vst [vmem:[#allocation1] sm:$0xf] %v5_v0 }
   0x9   :  { %v11_v1 = vld [vmem:[#allocation1 + $0x3] sm:$0x1]   ;;  %v23_v2 = vld [vmem:[#allocation1 + $0x1] sm:$0x1]   ;;  %v7_v3 = vld [vmem:[#allocation1] sm:$0x1]  }
   0xa   :  { %12 = vrot.lane.b32.xlu0 %v11_v1, %s39_s0  ;;  %24 = vrot.lane.b32.xlu1 %v23_v2, %s40_s8  ;;  %v17_v4 = vld [vmem:[#allocation1 + $0x2] sm:$0x1]   ;;  %9 = vst.msk [vmem:[#allocation0] sm:$0x1] %vm8_vm0, %v7_v3  }
   0xe   :  { %18 = vrot.lane.b32.xlu0 %v17_v4, %s41_s9 }
  0x7c   :  { %v13_v5 = vpop.permute.xlu0 %12   ;;  %v25_v6 = vpop.permute.xlu1 %24  }
  0x7d   :  { %15 = vst.msk [vmem:[#allocation0] sm:$0x1] %vm14_vm1, %v13_v5  }
  0x80   :  { %v19_v7 = vpop.permute.xlu0 %18  }
  0x81   :  { %21 = vst.msk [vmem:[#allocation0] sm:$0x1] %vm20_vm2, %v19_v7  }
  0x82   :  { %27 = vst.msk [vmem:[#allocation0] sm:$0x1] %vm26_vm3, %v25_v6  }
  0x89   :  { %v32_v8 = vld [vmem:[#allocation0] sm:$0x1] }
  0x8a   :  { %35 = vst [vmem:[%s59_s1] sm:$0x1] %v32_v8 }

// kernel: tile.13
= control target key start
LH: loop header
LB: loop body
LE: loop exit
PB: predicated region body
PF: predicated region fallthrough
CT: control target
= control target key end

     0   :  { %s22_s0 = inlined_call_operand.vmem [shape: f32[32], index: 0, kind: input, shape index: {}]   ;;  %s23_s1 = inlined_call_operand.vmem [shape: f32[4,32], index: 1, kind: output, shape index: {}]  }
   0x1   :  { %v4_v0 = vld [vmem:[%s22_s0] ss:$0 sm:$0xff] }
   0x2   :  { %5 = vst [vmem:[%s23_s1] sm:$0xf] %v4_v0 }

// kernel: layer_norm.1
= control target key start
LH: loop header
LB: loop body
LE: loop exit
PB: predicated region body
PF: predicated region fallthrough
CT: control target
= control target key end

     0   :  { %v2008_v3 = vmov 0.0   ;;  %vm2009_vm0 = vmmov 0   ;;  %s2731_s0 = inlined_call_operand.vmem [shape: f32[4,128], index: 0, kind: input, shape index: {}]   ;;  %s2732_s1 = inlined_call_operand.vmem [shape: f32[128,128], index: 1, kind: input, shape index: {}]   ;;  %s2733_s2 = inlined_call_operand.vmem [shape: f32[1,128], index: 2, kind: input, shape index: {}]   ;;  %s2734_s3 = inlined_call_operand.vmem [shape: f32[1,128], index: 3, kind: input, shape index: {}]   ;;  %s2735_s4 = inlined_call_operand.vmem [shape: f32[4,128], index: 4, kind: output, shape index: {}]  }
   0x1   :  { %v33_v0 = vld [vmem:[%s2732_s1 + $0x78] sm:$0xff]  ;;  %v32_v1 = vld [vmem:[%s2732_s1 + $0x70] sm:$0xff]  ;;  %v31_v2 = vld [vmem:[%s2732_s1 + $0x68] sm:$0xff]  ;;  %1584 = vmatprep.subr.mxu0 %v2008_v3  ;;  %1619 = vmatprep.subr.mxu1 %v2008_v3 }
   0x2   :  { %v2045_v4 = vand.u32 4294901760, %v33_v0  ;;  %v2047_v5 = vand.u32 4294901760, %v32_v1  ;;  %v2049_v6 = vand.u32 4294901760, %v31_v2  ;;  %v30_v7 = vld [vmem:[%s2732_s1 + $0x60] sm:$0xff]  ;;  %v29_v8 = vld [vmem:[%s2732_s1 + $0x58] sm:$0xff]  ;;  %v28_v9 = vld [vmem:[%s2732_s1 + $0x50] sm:$0xff]  ;;  %1616 = vmatprep.mubr.msk.f32.mxu0 %vm2009_vm0, %v2008_v3  ;;  %1651 = vmatprep.mubr.msk.f32.mxu1 %vm2009_vm0, %v2008_v3 }
   0x3   :  { %v2061_v10 = vand.u32 4294901760, %v30_v7  ;;  %v2063_v11 = vand.u32 4294901760, %v29_v8  ;;  %v2065_v12 = vand.u32 4294901760, %v28_v9  ;;  %v27_v13 = vld [vmem:[%s2732_s1 + $0x48] sm:$0xff]  ;;  %v26_v14 = vld [vmem:[%s2732_s1 + $0x40] sm:$0xff]  ;;  %v25_v19 = vld [vmem:[%s2732_s1 + $0x38] sm:$0xff] }
   0x4   :  { %1585 = vmatpush3.msra.mxu0 %v2045_v4  ;;  %v2079_v15 = vsub.f32 %v33_v0, %v2045_v4  ;;  %v2082_v16 = vsub.f32 %v32_v1, %v2047_v5  ;;  %v2084_v17 = vand.u32 4294901760, %v27_v13  ;;  %v2087_v18 = vsub.f32 %v31_v2, %v2049_v6  ;;  %v24_v26 = vld [vmem:[%s2732_s1 + $0x30] sm:$0xff]  ;;  %v23_v36 = vld [vmem:[%s2732_s1 + $0x28] sm:$0xff]  ;;  %v22_v41 = vld [vmem:[%s2732_s1 + $0x20] sm:$0xff] }
   0x5   :  { %1586 = vmatprep.subr.mxu0 %v2008_v3  ;;  %v2094_v20 = vsub.f32 %v30_v7, %v2061_v10  ;;  %v2097_v21 = vsub.f32 %v29_v8, %v2063_v11  ;;  %v2109_v25 = vand.u32 4294901760, %v26_v14  ;;  %v2118_v28 = vand.u32 4294901760, %v25_v19  ;;  %v21_v49 = vld [vmem:[%s2732_s1 + $0x18] sm:$0xff]  ;;  %v2183_v50 = vld [vmem:[%s2731_s0] sm:$0xff]  ;;  %v20_v54 = vld [vmem:[%s2732_s1 + $0x10] sm:$0xff] }
   0x6   :  { %1587 = vmatpush3.msra.mxu0 %v2047_v5  ;;  %v2101_v22 = vand.u32 4294901760, %v2079_v15  ;;  %v2104_v23 = vand.u32 4294901760, %v2082_v16  ;;  %v2107_v24 = vand.u32 4294901760, %v2087_v18  ;;  %v2124_v30 = vsub.f32 %v28_v9, %v2065_v12  ;;  %2748 = vst [vmem:[#allocation3_spill] sm:$0xff] %v2183_v50  ;;  %v19_v60 = vld [vmem:[%s2732_s1 + $0x8] sm:$0xff]  ;;  %v18_v7 = vld [vmem:[%s2732_s1] sm:$0xff] }
   0x7   :  { %1588 = vmatprep.subr.mxu0 %v2008_v3  ;;  %v2116_v27 = vand.u32 4294901760, %v2094_v20  ;;  %v2121_v29 = vand.u32 4294901760, %v2097_v21  ;;  %v2134_v34 = vsub.f32 %v27_v13, %v2084_v17  ;;  %v2137_v35 = vand.u32 4294901760, %v24_v26 }
   0x8   :  { %1589 = vmatpush3.msra.mxu0 %v2049_v6  ;;  %v129_v31 = vsub.f32 %v2079_v15, %v2101_v22  ;;  %v136_v32 = vsub.f32 %v2082_v16, %v2104_v23  ;;  %v143_v33 = vsub.f32 %v2087_v18, %v2107_v24  ;;  %v2150_v40 = vand.u32 4294901760, %v2124_v30 }
   0x9   :  { %1590 = vmatprep.subr.mxu0 %v2008_v3  ;;  %v150_v39 = vsub.f32 %v2094_v20, %v2116_v27  ;;  %v157_v42 = vsub.f32 %v2097_v21, %v2121_v29  ;;  %v2159_v43 = vsub.f32 %v26_v14, %v2109_v25  ;;  %v2165_v45 = vand.u32 4294901760, %v23_v36 }
   0xa   :  { %1591 = vmatpush3.msra.mxu0 %v2061_v10  ;;  %v2143_v37 = vand.u32 4294901760, %v129_v31  ;;  %v2145_v38 = vand.u32 4294901760, %v136_v32  ;;  %v2163_v44 = vand.u32 4294901760, %v143_v33  ;;  %v2168_v46 = vand.u32 4294901760, %v2134_v34 }
   0xb   :  { %1592 = vmatprep.subr.mxu0 %v2008_v3  ;;  %v2171_v47 = vsub.f32 %v25_v19, %v2118_v28  ;;  %v2175_v48 = vand.u32 4294901760, %v22_v41  ;;  %v2187_v51 = vand.u32 4294901760, %v150_v39  ;;  %v164_v52 = vsub.f32 %v2124_v30, %v2150_v40 }
   0xc   :  { %1593 = vmatpush3.msra.mxu0 %v2063_v11  ;;  %1620 = vmatpush3.msra.mxu1 %v2143_v37  ;;  %v2192_v53 = vand.u32 4294901760, %v2159_v43  ;;  %v2198_v55 = vsub.f32 %v24_v26, %v2137_v35  ;;  %v2202_v56 = vand.u32 4294901760, %v157_v42  ;;  %v171_v58 = vsub.f32 %v2134_v34, %v2168_v46 }
   0xd   :  { %1594 = vmatprep.subr.mxu0 %v2008_v3  ;;  %1621 = vmatprep.subr.mxu1 %v2008_v3  ;;  %2749 = vst [vmem:[#allocation4_spill] sm:$0xff] %v2187_v51  ;;  %v2205_v57 = vand.u32 4294901760, %v2171_v47  ;;  %v2211_v59 = vand.u32 4294901760, %v21_v49  ;;  %v2217_v61 = vsub.f32 %v23_v36, %v2165_v45  ;;  %v2220_v62 = vand.u32 4294901760, %v2183_v50 }
   0xe   :  { %1595 = vmatpush3.msra.mxu0 %v2065_v12  ;;  %1622 = vmatpush3.msra.mxu1 %v2145_v38  ;;  %2750 = vst [vmem:[#allocation5_spill] sm:$0xff] %v2202_v56  ;;  %v2224_v63 = vand.u32 4294901760, %v20_v54  ;;  %v2228_v0 = vand.u32 4294901760, %v164_v52  ;;  %v178_v1 = vsub.f32 %v2159_v43, %v2192_v53  ;;  %v2233_v2 = vand.u32 4294901760, %v2198_v55 }
   0xf   :  { %1596 = vmatprep.subr.mxu0 %v2008_v3  ;;  %1623 = vmatprep.subr.mxu1 %v2008_v3  ;;  %v2239_v8 = vsub.f32 %v22_v41, %v2175_v48  ;;  %v185_v9 = vsub.f32 %v2171_v47, %v2205_v57  ;;  %v2245_v13 = vand.u32 4294901760, %v19_v60  ;;  %v2249_v14 = vand.u32 4294901760, %v171_v58 }
  0x10   :  { %1597 = vmatpush3.msra.mxu0 %v2084_v17  ;;  %1624 = vmatpush3.msra.mxu1 %v2163_v44  ;;  %2751 = vst [vmem:[#allocation6_spill] sm:$0xff] %v2228_v0  ;;  %v2252_v19 = vand.u32 4294901760, %v2217_v61  ;;  %v2256_v26 = vsub.f32 %v2183_v50, %v2220_v62  ;;  %v2259_v31 = vsub.f32 %v21_v49, %v2211_v59  ;;  %v2263_v32 = vand.u32 4294901760, %v18_v7 }
  0x11   :  { %1598 = vmatprep.subr.mxu0 %v2008_v3  ;;  %1625 = vmatprep.subr.mxu1 %v2008_v3  ;;  %2752 = vst [vmem:[#allocation7_spill] sm:$0xff] %v2249_v14  ;;  %v2267_v33 = vand.u32 4294901760, %v178_v1  ;;  %v192_v36 = vsub.f32 %v2198_v55, %v2233_v2  ;;  %v2272_v39 = vand.u32 4294901760, %v2239_v8  ;;  %v2275_v41 = vsub.f32 %v20_v54, %v2224_v63 }
  0x12   :  { %1599 = vmatpush3.msra.mxu0 %v2109_v25  ;;  %1626 = vmatpush3.msra.mxu1 %v2187_v51  ;;  %v2279_v42 = vand.u32 4294901760, %v185_v9  ;;  %v199_v49 = vsub.f32 %v2217_v61, %v2252_v19  ;;  %v2287_v58 = vand.u32 4294901760, %v2259_v31  ;;  %v2290_v54 = vsub.f32 %v19_v60, %v2245_v13 }
  0x13   :  { %1600 = vmatprep.subr.mxu0 %v2008_v3  ;;  %1627 = vmatprep.subr.mxu1 %v2008_v3  ;;  %2753 = vst [vmem:[#allocation8_spill] sm:$0xff] %v2267_v33  ;;  %v2296_v1 = vand.u32 4294901760, %v192_v36  ;;  %v206_v9 = vsub.f32 %v2239_v8, %v2272_v39  ;;  %v2301_v52 = vand.u32 4294901760, %v2275_v41  ;;  %v2304_v50 = vsub.f32 %v18_v7, %v2263_v32 }
  0x14   :  { %1601 = vmatpush3.msra.mxu0 %v2118_v28  ;;  %1628 = vmatpush3.msra.mxu1 %v2202_v56  ;;  %2754 = vst [vmem:[#allocation9_spill] sm:$0xff] %v2279_v42  ;;  %2755 = vst [vmem:[#allocation10_spill] sm:$0xff] %v2287_v58  ;;  %v2310_v60 = vand.u32 4294901760, %v199_v49  ;;  %v2758_v36 = vand.u32 4294901760, %v2256_v26  ;;  %v2318_v7 = vand.u32 4294901760, %v2290_v54 }
  0x15   :  { %1602 = vmatprep.subr.mxu0 %v2008_v3  ;;  %1629 = vmatprep.subr.mxu1 %v2008_v3  ;;  %2756 = vst [vmem:[#allocation11_spill] sm:$0xff] %v2296_v1  ;;  %2757 = vst [vmem:[#allocation12_spill] sm:$0xff] %v2301_v52  ;;  %v2324_v49 = vand.u32 4294901760, %v206_v9 }
  0x16   :  { %1603 = vmatpush3.msra.mxu0 %v2137_v35  ;;  %1630 = vmatpush3.msra.mxu1 %v2228_v0  ;;  %2759 = vst [vmem:[#allocation13_spill] sm:$0xff] %v2318_v7  ;;  %v227_v9 = vsub.f32 %v2290_v54, %v2318_v7 }
  0x17   :  { %1604 = vmatprep.subr.mxu0 %v2008_v3  ;;  %1631 = vmatprep.subr.mxu1 %v2008_v3 }
  0x18   :  { %1605 = vmatpush3.msra.mxu0 %v2165_v45  ;;  %1632 = vmatpush3.msra.mxu1 %v2249_v14  ;;  %v213_v14 = vsub.f32 %v2259_v31, %v2287_v58 }
  0x19   :  { %1606 = vmatprep.subr.mxu0 %v2008_v3  ;;  %1633 = vmatprep.subr.mxu1 %v2008_v3 }
  0x1a   :  { %1607 = vmatpush3.msra.mxu0 %v2175_v48  ;;  %1634 = vmatpush3.msra.mxu1 %v2267_v33  ;;  %v118_v33 = vsub.f32 %v2256_v26, %v2758_v36  ;;  %v2329_v36 = vand.u32 4294901760, %v2304_v50  ;;  %v2335_v56 = vand.u32 4294901760, %v213_v14  ;;  %v2350_v14 = vand.u32 4294901760, %v227_v9 }
  0x1b   :  { %1608 = vmatprep.subr.mxu0 %v2008_v3  ;;  %1635 = vmatprep.subr.mxu1 %v2008_v3 }
  0x1c   :  { %1609 = vmatpush3.msra.mxu0 %v2211_v59  ;;  %1636 = vmatpush3.msra.mxu1 %v2279_v42  ;;  %v220_v42 = vsub.f32 %v2275_v41, %v2301_v52  ;;  %2760 = vst [vmem:[#allocation14_spill] sm:$0xff] %v2329_v36  ;;  %v119_v0 = vand.u32 4294901760, %v118_v33  ;;  %v234_v51 = vsub.f32 %v2304_v50, %v2329_v36 }
  0x1d   :  { %1610 = vmatprep.subr.mxu0 %v2008_v3  ;;  %1637 = vmatprep.subr.mxu1 %v2008_v3 }
  0x1e   :  { %1611 = vmatpush3.msra.mxu0 %v2224_v63  ;;  %1638 = vmatpush3.msra.mxu1 %v2296_v1  ;;  %v2343_v1 = vand.u32 4294901760, %v220_v42  ;;  %v2356_v33 = vand.u32 4294901760, %v234_v51  ;;  %v2761_v51 = vand.u32 4294901760, %v2256_v26  ;;  %v2768_v42 = vld [vmem:[#allocation11_spill] sm:$0xff] }
  0x1f   :  { %1612 = vmatprep.subr.mxu0 %v2008_v3  ;;  %1639 = vmatprep.subr.mxu1 %v2008_v3 }
  0x20   :  { %1613 = vmatpush3.msra.mxu0 %v2245_v13  ;;  %1640 = vmatpush3.msra.mxu1 %v2310_v60 }
  0x21   :  { %1614 = vmatprep.subr.mxu0 %v2008_v3  ;;  %1641 = vmatprep.subr.mxu1 %v2008_v3 }
  0x22   :  { %1615 = vmatpush3.msra.mxu0 %v2263_v32  ;;  %1642 = vmatpush3.msra.mxu1 %v2324_v49 }
  0x23   :  { %1643 = vmatprep.subr.mxu1 %v2008_v3  ;;  %1654 = vmatprep.subr.mxu0 %v2008_v3 }
  0x24   :  { %1617 = vmatmul.mubr.f32.vlgmr.msra.gmra.mxu0 %v119_v0  ;;  %1644 = vmatpush3.msra.mxu1 %v2335_v56  ;;  %v2766_v0 = vld [vmem:[#allocation8_spill] sm:$0xff] }
  0x25   :  { %1655 = vmatpush3.msra.mxu0 %v2079_v15  ;;  %1645 = vmatprep.subr.mxu1 %v2008_v3 }
  0x26   :  { %1656 = vmatprep.subr.mxu0 %v2008_v3  ;;  %1646 = vmatpush3.msra.mxu1 %v2343_v1 }
  0x27   :  { %1657 = vmatpush3.msra.mxu0 %v2082_v16  ;;  %1647 = vmatprep.subr.mxu1 %v2008_v3 }
  0x28   :  { %1658 = vmatprep.subr.mxu0 %v2008_v3  ;;  %1648 = vmatpush3.msra.mxu1 %v2350_v14 }
  0x29   :  { %1659 = vmatpush3.msra.mxu0 %v2087_v18  ;;  %1649 = vmatprep.subr.mxu1 %v2008_v3 }
  0x2a   :  { %1660 = vmatprep.subr.mxu0 %v2008_v3  ;;  %1650 = vmatpush3.msra.mxu1 %v2356_v33 }
  0x2b   :  { %1661 = vmatpush3.msra.mxu0 %v2094_v20  ;;  %1652 = vmatmul.mubr.f32.vlgmr.msra.gmra.mxu1 %v2220_v62 }
  0x2c   :  { %1662 = vmatprep.subr.mxu0 %v2008_v3  ;;  %1689 = vmatprep.subr.mxu1 %v2008_v3 }
  0x2d   :  { %1663 = vmatpush3.msra.mxu0 %v2097_v21  ;;  %1690 = vmatpush3.msra.mxu1 %v2045_v4 }
  0x2e   :  { %1664 = vmatprep.subr.mxu0 %v2008_v3  ;;  %1691 = vmatprep.subr.mxu1 %v2008_v3 }
  0x2f   :  { %1665 = vmatpush3.msra.mxu0 %v2124_v30  ;;  %1692 = vmatpush3.msra.mxu1 %v2047_v5 }
  0x30   :  { %1666 = vmatprep.subr.mxu0 %v2008_v3  ;;  %1693 = vmatprep.subr.mxu1 %v2008_v3 }
  0x31   :  { %1667 = vmatpush3.msra.mxu0 %v2134_v34  ;;  %1694 = vmatpush3.msra.mxu1 %v2049_v6 }
  0x32   :  { %1668 = vmatprep.subr.mxu0 %v2008_v3  ;;  %1695 = vmatprep.subr.mxu1 %v2008_v3 }
  0x33   :  { %1669 = vmatpush3.msra.mxu0 %v2159_v43  ;;  %1696 = vmatpush3.msra.mxu1 %v2061_v10 }
  0x34   :  { %1670 = vmatprep.subr.mxu0 %v2008_v3  ;;  %1697 = vmatprep.subr.mxu1 %v2008_v3 }
  0x35   :  { %1671 = vmatpush3.msra.mxu0 %v2171_v47  ;;  %1698 = vmatpush3.msra.mxu1 %v2063_v11 }
  0x36   :  { %1672 = vmatprep.subr.mxu0 %v2008_v3  ;;  %1699 = vmatprep.subr.mxu1 %v2008_v3 }
  0x37   :  { %1673 = vmatpush3.msra.mxu0 %v2198_v55  ;;  %1700 = vmatpush3.msra.mxu1 %v2065_v12 }
  0x38   :  { %1674 = vmatprep.subr.mxu0 %v2008_v3  ;;  %1701 = vmatprep.subr.mxu1 %v2008_v3 }
  0x39   :  { %1675 = vmatpush3.msra.mxu0 %v2217_v61  ;;  %1702 = vmatpush3.msra.mxu1 %v2084_v17 }
  0x3a   :  { %1676 = vmatprep.subr.mxu0 %v2008_v3  ;;  %1703 = vmatprep.subr.mxu1 %v2008_v3 }
  0x3b   :  { %1677 = vmatpush3.msra.mxu0 %v2239_v8  ;;  %1704 = vmatpush3.msra.mxu1 %v2109_v25 }
  0x3c   :  { %1678 = vmatprep.subr.mxu0 %v2008_v3  ;;  %1705 = vmatprep.subr.mxu1 %v2008_v3 }
  0x3d   :  { %1679 = vmatpush3.msra.mxu0 %v2259_v31  ;;  %1706 = vmatpush3.msra.mxu1 %v2118_v28 }
  0x3e   :  { %1680 = vmatprep.subr.mxu0 %v2008_v3  ;;  %1707 = vmatprep.subr.mxu1 %v2008_v3 }
  0x3f   :  { %1681 = vmatpush3.msra.mxu0 %v2275_v41  ;;  %1708 = vmatpush3.msra.mxu1 %v2137_v35 }
  0x40   :  { %1682 = vmatprep.subr.mxu0 %v2008_v3  ;;  %1709 = vmatprep.subr.mxu1 %v2008_v3 }
  0x41   :  { %1683 = vmatpush3.msra.mxu0 %v2290_v54  ;;  %1710 = vmatpush3.msra.mxu1 %v2165_v45 }
  0x42   :  { %1684 = vmatprep.subr.mxu0 %v2008_v3  ;;  %1711 = vmatprep.subr.mxu1 %v2008_v3 }
  0x43   :  { %1685 = vmatpush3.msra.mxu0 %v2304_v50  ;;  %1686 = vmatprep.mubr.msk.f32.mxu0 %vm2009_vm0, %v2008_v3 }
  0x44   :  { %1712 = vmatpush3.msra.mxu1 %v2175_v48  ;;  %1687 = vmatmul.mubr.f32.vlgmr.msra.gmra.mxu0 %v2256_v26  ;;  %v2767_v26 = vld [vmem:[#allocation9_spill] sm:$0xff] }
  0x45   :  { %1713 = vmatprep.subr.mxu1 %v2008_v3  ;;  %1724 = vmatprep.subr.mxu0 %v2008_v3 }
  0x46   :  { %1714 = vmatpush3.msra.mxu1 %v2211_v59  ;;  %1725 = vmatpush3.msra.mxu0 %v2101_v22 }
  0x47   :  { %1715 = vmatprep.subr.mxu1 %v2008_v3  ;;  %1726 = vmatprep.subr.mxu0 %v2008_v3 }
  0x48   :  { %1716 = vmatpush3.msra.mxu1 %v2224_v63  ;;  %1727 = vmatpush3.msra.mxu0 %v2104_v23 }
  0x49   :  { %1717 = vmatprep.subr.mxu1 %v2008_v3  ;;  %1728 = vmatprep.subr.mxu0 %v2008_v3 }
  0x4a   :  { %1718 = vmatpush3.msra.mxu1 %v2245_v13  ;;  %1729 = vmatpush3.msra.mxu0 %v2107_v24 }
  0x4b   :  { %1719 = vmatprep.subr.mxu1 %v2008_v3  ;;  %1730 = vmatprep.subr.mxu0 %v2008_v3 }
  0x4c   :  { %1720 = vmatpush3.msra.mxu1 %v2263_v32  ;;  %1721 = vmatprep.mubr.msk.f32.mxu1 %vm2009_vm0, %v2008_v3 }
  0x4d   :  { %1731 = vmatpush3.msra.mxu0 %v2116_v27  ;;  %1722 = vmatmul.mubr.f32.vlgmr.msra.gmra.mxu1 %v2761_v51 }
  0x4e   :  { %1732 = vmatprep.subr.mxu0 %v2008_v3  ;;  %1759 = vmatprep.subr.mxu1 %v2008_v3 }
  0x4f   :  { %1733 = vmatpush3.msra.mxu0 %v2121_v29  ;;  %1760 = vmatpush3.msra.mxu1 %v2045_v4 }
  0x50   :  { %1734 = vmatprep.subr.mxu0 %v2008_v3  ;;  %1761 = vmatprep.subr.mxu1 %v2008_v3 }
  0x51   :  { %1735 = vmatpush3.msra.mxu0 %v2150_v40  ;;  %1762 = vmatpush3.msra.mxu1 %v2047_v5 }
  0x52   :  { %1736 = vmatprep.subr.mxu0 %v2008_v3  ;;  %1763 = vmatprep.subr.mxu1 %v2008_v3 }
  0x53   :  { %1737 = vmatpush3.msra.mxu0 %v2168_v46  ;;  %1764 = vmatpush3.msra.mxu1 %v2049_v6 }
  0x54   :  { %1738 = vmatprep.subr.mxu0 %v2008_v3  ;;  %1765 = vmatprep.subr.mxu1 %v2008_v3 }
  0x55   :  { %1739 = vmatpush3.msra.mxu0 %v2192_v53  ;;  %1766 = vmatpush3.msra.mxu1 %v2061_v10 }
  0x56   :  { %1740 = vmatprep.subr.mxu0 %v2008_v3  ;;  %1767 = vmatprep.subr.mxu1 %v2008_v3 }
  0x57   :  { %1741 = vmatpush3.msra.mxu0 %v2205_v57  ;;  %1768 = vmatpush3.msra.mxu1 %v2063_v11 }
  0x58   :  { %1742 = vmatprep.subr.mxu0 %v2008_v3  ;;  %1769 = vmatprep.subr.mxu1 %v2008_v3 }
  0x59   :  { %1743 = vmatpush3.msra.mxu0 %v2233_v2  ;;  %1770 = vmatpush3.msra.mxu1 %v2065_v12 }
  0x5a   :  { %1744 = vmatprep.subr.mxu0 %v2008_v3  ;;  %1771 = vmatprep.subr.mxu1 %v2008_v3 }
  0x5b   :  { %1745 = vmatpush3.msra.mxu0 %v2252_v19  ;;  %1772 = vmatpush3.msra.mxu1 %v2084_v17 }
  0x5c   :  { %1746 = vmatprep.subr.mxu0 %v2008_v3  ;;  %1773 = vmatprep.subr.mxu1 %v2008_v3 }
  0x5d   :  { %1747 = vmatpush3.msra.mxu0 %v2272_v39  ;;  %1774 = vmatpush3.msra.mxu1 %v2109_v25 }
  0x5e   :  { %1748 = vmatprep.subr.mxu0 %v2008_v3  ;;  %1775 = vmatprep.subr.mxu1 %v2008_v3 }
  0x5f   :  { %1749 = vmatpush3.msra.mxu0 %v2287_v58  ;;  %1776 = vmatpush3.msra.mxu1 %v2118_v28 }
  0x60   :  { %1750 = vmatprep.subr.mxu0 %v2008_v3  ;;  %1777 = vmatprep.subr.mxu1 %v2008_v3 }
  0x61   :  { %1751 = vmatpush3.msra.mxu0 %v2301_v52  ;;  %1778 = vmatpush3.msra.mxu1 %v2137_v35 }
  0x62   :  { %1752 = vmatprep.subr.mxu0 %v2008_v3  ;;  %1779 = vmatprep.subr.mxu1 %v2008_v3 }
  0x63   :  { %1753 = vmatpush3.msra.mxu0 %v2318_v7  ;;  %1780 = vmatpush3.msra.mxu1 %v2165_v45 }
  0x64   :  { %1754 = vmatprep.subr.mxu0 %v2008_v3  ;;  %1781 = vmatprep.subr.mxu1 %v2008_v3 }
  0x65   :  { %1755 = vmatpush3.msra.mxu0 %v2329_v36  ;;  %1756 = vmatprep.mubr.msk.f32.mxu0 %vm2009_vm0, %v2008_v3 }
  0x66   :  { %1782 = vmatpush3.msra.mxu1 %v2175_v48  ;;  %1757 = vmatmul.mubr.f32.vlgmr.msra.gmra.mxu0 %v2220_v62 }
  0x67   :  { %1783 = vmatprep.subr.mxu1 %v2008_v3  ;;  %1791 = vmatprep.mubr.msk.f32.mxu1 %vm2009_vm0, %v2008_v3 }
  0x68   :  { %1784 = vmatpush3.msra.mxu1 %v2211_v59  ;;  %1794 = vmatprep.subr.mxu0 %v2008_v3 }
  0x69   :  { %1785 = vmatprep.subr.mxu1 %v2008_v3  ;;  %1795 = vmatpush3.msra.mxu0 %v2045_v4 }
  0x6a   :  { %1786 = vmatpush3.msra.mxu1 %v2224_v63  ;;  %1796 = vmatprep.subr.mxu0 %v2008_v3 }
  0x6b   :  { %1787 = vmatprep.subr.mxu1 %v2008_v3  ;;  %1797 = vmatpush3.msra.mxu0 %v2047_v5 }
  0x6c   :  { %1788 = vmatpush3.msra.mxu1 %v2245_v13  ;;  %1798 = vmatprep.subr.mxu0 %v2008_v3 }
  0x6d   :  { %1789 = vmatprep.subr.mxu1 %v2008_v3  ;;  %1799 = vmatpush3.msra.mxu0 %v2049_v6 }
  0x6e   :  { %1790 = vmatpush3.msra.mxu1 %v2263_v32  ;;  %1800 = vmatprep.subr.mxu0 %v2008_v3 }
  0x6f   :  { %1792 = vmatmul.mubr.f32.vlgmr.msra.gmra.mxu1 %v2220_v62  ;;  %1829 = vmatprep.subr.mxu1 %v2008_v3  ;;  %v2765_v62 = vld [vmem:[#allocation7_spill] sm:$0xff] }
  0x70   :  { %1830 = vmatpush3.msra.mxu1 %v2143_v37  ;;  %1801 = vmatpush3.msra.mxu0 %v2061_v10  ;;  %v2762_v37 = vld [vmem:[#allocation4_spill] sm:$0xff] }
  0x71   :  { %1831 = vmatprep.subr.mxu1 %v2008_v3  ;;  %1802 = vmatprep.subr.mxu0 %v2008_v3 }
  0x72   :  { %1832 = vmatpush3.msra.mxu1 %v2145_v38  ;;  %1803 = vmatpush3.msra.mxu0 %v2063_v11  ;;  %v2763_v38 = vld [vmem:[#allocation5_spill] sm:$0xff] }
  0x73   :  { %1833 = vmatprep.subr.mxu1 %v2008_v3  ;;  %1804 = vmatprep.subr.mxu0 %v2008_v3 }
  0x74   :  { %1834 = vmatpush3.msra.mxu1 %v2163_v44  ;;  %1805 = vmatpush3.msra.mxu0 %v2065_v12  ;;  %v2764_v44 = vld [vmem:[#allocation6_spill] sm:$0xff] }
  0x75   :  { %1835 = vmatprep.subr.mxu1 %v2008_v3  ;;  %1806 = vmatprep.subr.mxu0 %v2008_v3 }
  0x76   :  { %1836 = vmatpush3.msra.mxu1 %v2762_v37  ;;  %1807 = vmatpush3.msra.mxu0 %v2084_v17 }
  0x77   :  { %1837 = vmatprep.subr.mxu1 %v2008_v3  ;;  %1808 = vmatprep.subr.mxu0 %v2008_v3 }
  0x78   :  { %1838 = vmatpush3.msra.mxu1 %v2763_v38  ;;  %1809 = vmatpush3.msra.mxu0 %v2109_v25 }
  0x79   :  { %1839 = vmatprep.subr.mxu1 %v2008_v3  ;;  %1810 = vmatprep.subr.mxu0 %v2008_v3 }
  0x7a   :  { %1840 = vmatpush3.msra.mxu1 %v2764_v44  ;;  %1811 = vmatpush3.msra.mxu0 %v2118_v28 }
  0x7b   :  { %1841 = vmatprep.subr.mxu1 %v2008_v3  ;;  %1812 = vmatprep.subr.mxu0 %v2008_v3 }
  0x7c   :  { %1842 = vmatpush3.msra.mxu1 %v2765_v62  ;;  %1813 = vmatpush3.msra.mxu0 %v2137_v35 }
  0x7d   :  { %1843 = vmatprep.subr.mxu1 %v2008_v3  ;;  %1814 = vmatprep.subr.mxu0 %v2008_v3 }
  0x7e   :  { %1844 = vmatpush3.msra.mxu1 %v2766_v0  ;;  %1815 = vmatpush3.msra.mxu0 %v2165_v45 }
  0x7f   :  { %1845 = vmatprep.subr.mxu1 %v2008_v3  ;;  %1816 = vmatprep.subr.mxu0 %v2008_v3 }
  0x80   :  { %1846 = vmatpush3.msra.mxu1 %v2767_v26  ;;  %1817 = vmatpush3.msra.mxu0 %v2175_v48 }
  0x81   :  { %1847 = vmatprep.subr.mxu1 %v2008_v3  ;;  %1818 = vmatprep.subr.mxu0 %v2008_v3 }
  0x82   :  { %1848 = vmatpush3.msra.mxu1 %v2768_v42  ;;  %1861 = vmatprep.mubr.msk.f32.mxu1 %vm2009_vm0, %v2008_v3 }
  0x83   :  { %1849 = vmatprep.subr.mxu1 %v2008_v3  ;;  %1819 = vmatpush3.msra.mxu0 %v2211_v59 }
  0x84   :  { %1850 = vmatpush3.msra.mxu1 %v2310_v60  ;;  %1820 = vmatprep.subr.mxu0 %v2008_v3 }
  0x85   :  { %1851 = vmatprep.subr.mxu1 %v2008_v3  ;;  %1821 = vmatpush3.msra.mxu0 %v2224_v63 }
  0x86   :  { %1852 = vmatpush3.msra.mxu1 %v2324_v49  ;;  %1822 = vmatprep.subr.mxu0 %v2008_v3 }
  0x87   :  { %1853 = vmatprep.subr.mxu1 %v2008_v3  ;;  %1823 = vmatpush3.msra.mxu0 %v2245_v13 }
  0x88   :  { %1854 = vmatpush3.msra.mxu1 %v2335_v56  ;;  %1824 = vmatprep.subr.mxu0 %v2008_v3 }
  0x89   :  { %1855 = vmatprep.subr.mxu1 %v2008_v3  ;;  %1825 = vmatpush3.msra.mxu0 %v2263_v32 }
  0x8a   :  { %1856 = vmatpush3.msra.mxu1 %v2343_v1  ;;  %1826 = vmatprep.mubr.msk.f32.mxu0 %vm2009_vm0, %v2008_v3 }
  0x8b   :  { %1857 = vmatprep.subr.mxu1 %v2008_v3  ;;  %1864 = vmatprep.subr.mxu0 %v2008_v3 }
  0x8c   :  { %1858 = vmatpush3.msra.mxu1 %v2350_v14 }
  0x8d   :  { %1859 = vmatprep.subr.mxu1 %v2008_v3 }
  0x8e   :  { %1860 = vmatpush3.msra.mxu1 %v2356_v33  ;;  %v2769_v33 = vld [vmem:[#allocation3_spill] sm:$0xff] }
  0x8f   :  { %1899 = vmatprep.subr.mxu1 %v2008_v3 }
  0xe4   :  { %v121_v56 = vpop.f32.mrf.mxu0 }
  0xe6   :  { %v1618_v60 = vpop.f32.mrf.mxu0 }
  0xeb   :  { %v272_v49 = vpop.f32.mrf.mxu1 }
  0xec   :  { %v273_v62 = vadd.f32 %v272_v49, %v121_v56 }
  0xed   :  { %v1653_v9 = vpop.f32.mrf.mxu1 }
 0x104   :  { %v376_v1 = vpop.f32.mrf.mxu0 }
 0x105   :  { %v377_v26 = vadd.f32 %v376_v1, %v273_v62 }
 0x106   :  { %v1688_v51 = vpop.f32.mrf.mxu0 }
 0x10d   :  { %v465_v37 = vpop.f32.mrf.mxu1 }
 0x10e   :  { %v466_v42 = vadd.f32 %v465_v37, %v377_v26 }
 0x10f   :  { %v1723_v38 = vpop.f32.mrf.mxu1 }
 0x126   :  { %v584_v44 = vpop.f32.mrf.mxu0 }
 0x127   :  { %v585_v14 = vadd.f32 %v584_v44, %v466_v42 }
 0x128   :  { %v1758_v0 = vpop.f32.mrf.mxu0 }
 0x12f   :  { %v671_v36 = vpop.f32.mrf.mxu1 }
 0x130   :  { %v672_v7 = vadd.f32 %v671_v36, %v585_v14 }
 0x131   :  { %v1793_v52 = vpop.f32.mrf.mxu1 }
 0x132   :  { %v2572_v58 = vsub.f32 %v2769_v33, %v672_v7 }
 0x134   :  { %v676_v60 = vmul.f32 %v2572_v58, %v2572_v58 }
 0x136   :  { %v2576_v9 = vand.u32 4294901760, %v676_v60 }
 0x138   :  { %v2579_v51 = vsub.f32 %v676_v60, %v2576_v9  ;;  %1862 = vmatmul.mubr.f32.vlgmr.msra.gmra.mxu1 %v2576_v9 }
 0x139   :  { %1900 = vmatpush3.msra.mxu1 %v2045_v4  ;;  %1931 = vmatprep.mubr.msk.f32.mxu1 %vm2009_vm0, %v2008_v3 }
 0x13a   :  { %1901 = vmatprep.subr.mxu1 %v2008_v3  ;;  %v760_v52 = vand.u32 4294901760, %v2579_v51 }
 0x13b   :  { %1902 = vmatpush3.msra.mxu1 %v2047_v5 }
 0x13c   :  { %1903 = vmatprep.subr.mxu1 %v2008_v3  ;;  %v761_v7 = vsub.f32 %v2579_v51, %v760_v52 }
 0x13d   :  { %1904 = vmatpush3.msra.mxu1 %v2049_v6 }
 0x13e   :  { %1905 = vmatprep.subr.mxu1 %v2008_v3  ;;  %v762_v36 = vand.u32 4294901760, %v761_v7 }
 0x13f   :  { %1906 = vmatpush3.msra.mxu1 %v2061_v10 }
 0x140   :  { %1907 = vmatprep.subr.mxu1 %v2008_v3  ;;  %1827 = vmatmul.mubr.f32.vlgmr.msra.gmra.mxu0 %v762_v36 }
 0x141   :  { %1865 = vmatpush3.msra.mxu0 %v2079_v15  ;;  %1908 = vmatpush3.msra.mxu1 %v2063_v11 }
 0x142   :  { %1866 = vmatprep.subr.mxu0 %v2008_v3  ;;  %1909 = vmatprep.subr.mxu1 %v2008_v3 }
 0x143   :  { %1867 = vmatpush3.msra.mxu0 %v2082_v16  ;;  %1910 = vmatpush3.msra.mxu1 %v2065_v12 }
 0x144   :  { %1868 = vmatprep.subr.mxu0 %v2008_v3  ;;  %1911 = vmatprep.subr.mxu1 %v2008_v3 }
 0x145   :  { %1869 = vmatpush3.msra.mxu0 %v2087_v18  ;;  %1912 = vmatpush3.msra.mxu1 %v2084_v17 }
 0x146   :  { %1870 = vmatprep.subr.mxu0 %v2008_v3  ;;  %1913 = vmatprep.subr.mxu1 %v2008_v3 }
 0x147   :  { %1871 = vmatpush3.msra.mxu0 %v2094_v20  ;;  %1914 = vmatpush3.msra.mxu1 %v2109_v25 }
 0x148   :  { %1872 = vmatprep.subr.mxu0 %v2008_v3  ;;  %1915 = vmatprep.subr.mxu1 %v2008_v3 }
 0x149   :  { %1873 = vmatpush3.msra.mxu0 %v2097_v21  ;;  %1916 = vmatpush3.msra.mxu1 %v2118_v28 }
 0x14a   :  { %1874 = vmatprep.subr.mxu0 %v2008_v3  ;;  %1917 = vmatprep.subr.mxu1 %v2008_v3 }
 0x14b   :  { %1875 = vmatpush3.msra.mxu0 %v2124_v30  ;;  %1918 = vmatpush3.msra.mxu1 %v2137_v35 }
 0x14c   :  { %1876 = vmatprep.subr.mxu0 %v2008_v3  ;;  %1919 = vmatprep.subr.mxu1 %v2008_v3 }
 0x14d   :  { %1877 = vmatpush3.msra.mxu0 %v2134_v34  ;;  %1920 = vmatpush3.msra.mxu1 %v2165_v45 }
 0x14e   :  { %1878 = vmatprep.subr.mxu0 %v2008_v3  ;;  %1921 = vmatprep.subr.mxu1 %v2008_v3 }
 0x14f   :  { %1879 = vmatpush3.msra.mxu0 %v2159_v43  ;;  %1922 = vmatpush3.msra.mxu1 %v2175_v48 }
 0x150   :  { %1880 = vmatprep.subr.mxu0 %v2008_v3  ;;  %1923 = vmatprep.subr.mxu1 %v2008_v3 }
 0x151   :  { %1881 = vmatpush3.msra.mxu0 %v2171_v47  ;;  %1924 = vmatpush3.msra.mxu1 %v2211_v59 }
 0x152   :  { %1882 = vmatprep.subr.mxu0 %v2008_v3  ;;  %1925 = vmatprep.subr.mxu1 %v2008_v3 }
 0x153   :  { %1883 = vmatpush3.msra.mxu0 %v2198_v55  ;;  %1926 = vmatpush3.msra.mxu1 %v2224_v63 }
 0x154   :  { %1884 = vmatprep.subr.mxu0 %v2008_v3  ;;  %1927 = vmatprep.subr.mxu1 %v2008_v3 }
 0x155   :  { %1885 = vmatpush3.msra.mxu0 %v2217_v61  ;;  %1928 = vmatpush3.msra.mxu1 %v2245_v13 }
 0x156   :  { %1886 = vmatprep.subr.mxu0 %v2008_v3  ;;  %1929 = vmatprep.subr.mxu1 %v2008_v3 }
 0x157   :  { %1887 = vmatpush3.msra.mxu0 %v2239_v8  ;;  %1930 = vmatpush3.msra.mxu1 %v2263_v32 }
 0x158   :  { %1888 = vmatprep.subr.mxu0 %v2008_v3  ;;  %1932 = vmatmul.mubr.f32.vlgmr.msra.gmra.mxu1 %v760_v52 }
 0x159   :  { %1969 = vmatprep.subr.mxu1 %v2008_v3  ;;  %1889 = vmatpush3.msra.mxu0 %v2259_v31 }
 0x15a   :  { %1970 = vmatpush3.msra.mxu1 %v2045_v4  ;;  %1890 = vmatprep.subr.mxu0 %v2008_v3  ;;  %v2770_v4 = vld [vmem:[#allocation10_spill] sm:$0xff] }
 0x15b   :  { %1971 = vmatprep.subr.mxu1 %v2008_v3  ;;  %1891 = vmatpush3.msra.mxu0 %v2275_v41 }
 0x15c   :  { %1972 = vmatpush3.msra.mxu1 %v2047_v5  ;;  %1892 = vmatprep.subr.mxu0 %v2008_v3  ;;  %v2771_v5 = vld [vmem:[#allocation12_spill] sm:$0xff] }
 0x15d   :  { %1973 = vmatprep.subr.mxu1 %v2008_v3  ;;  %1893 = vmatpush3.msra.mxu0 %v2290_v54 }
 0x15e   :  { %1974 = vmatpush3.msra.mxu1 %v2049_v6  ;;  %1894 = vmatprep.subr.mxu0 %v2008_v3  ;;  %v2772_v6 = vld [vmem:[#allocation13_spill] sm:$0xff] }
 0x15f   :  { %1975 = vmatprep.subr.mxu1 %v2008_v3  ;;  %1895 = vmatpush3.msra.mxu0 %v2304_v50 }
 0x160   :  { %1896 = vmatprep.mubr.msk.f32.mxu0 %vm2009_vm0, %v2008_v3  ;;  %1976 = vmatpush3.msra.mxu1 %v2061_v10  ;;  %v2773_v10 = vld [vmem:[#allocation14_spill] sm:$0xff] }
 0x161   :  { %1897 = vmatmul.mubr.f32.vlgmr.msra.gmra.mxu0 %v2579_v51  ;;  %1934 = vmatprep.subr.mxu0 %v2008_v3 }
 0x162   :  { %1977 = vmatprep.subr.mxu1 %v2008_v3  ;;  %1935 = vmatpush3.msra.mxu0 %v2101_v22 }
 0x163   :  { %1978 = vmatpush3.msra.mxu1 %v2063_v11  ;;  %1936 = vmatprep.subr.mxu0 %v2008_v3 }
 0x164   :  { %1979 = vmatprep.subr.mxu1 %v2008_v3  ;;  %1937 = vmatpush3.msra.mxu0 %v2104_v23 }
 0x165   :  { %1980 = vmatpush3.msra.mxu1 %v2065_v12  ;;  %1938 = vmatprep.subr.mxu0 %v2008_v3 }
 0x166   :  { %1981 = vmatprep.subr.mxu1 %v2008_v3  ;;  %1939 = vmatpush3.msra.mxu0 %v2107_v24 }
 0x167   :  { %1982 = vmatpush3.msra.mxu1 %v2084_v17  ;;  %1940 = vmatprep.subr.mxu0 %v2008_v3 }
 0x168   :  { %1983 = vmatprep.subr.mxu1 %v2008_v3  ;;  %1941 = vmatpush3.msra.mxu0 %v2116_v27 }
 0x169   :  { %1984 = vmatpush3.msra.mxu1 %v2109_v25  ;;  %1942 = vmatprep.subr.mxu0 %v2008_v3 }
 0x16a   :  { %1985 = vmatprep.subr.mxu1 %v2008_v3  ;;  %1943 = vmatpush3.msra.mxu0 %v2121_v29 }
 0x16b   :  { %1986 = vmatpush3.msra.mxu1 %v2118_v28  ;;  %1944 = vmatprep.subr.mxu0 %v2008_v3 }
 0x16c   :  { %1987 = vmatprep.subr.mxu1 %v2008_v3  ;;  %1945 = vmatpush3.msra.mxu0 %v2150_v40  ;;  %v1378_v40 = vld [vmem:[%s2733_s2] ss:$0 sm:$0xff] }
 0x16d   :  { %1988 = vmatpush3.msra.mxu1 %v2137_v35  ;;  %1946 = vmatprep.subr.mxu0 %v2008_v3 }
 0x16e   :  { %1989 = vmatprep.subr.mxu1 %v2008_v3  ;;  %1947 = vmatpush3.msra.mxu0 %v2168_v46 }
 0x16f   :  { %1990 = vmatpush3.msra.mxu1 %v2165_v45  ;;  %1948 = vmatprep.subr.mxu0 %v2008_v3  ;;  %v1379_v45 = vld [vmem:[%s2734_s3] ss:$0 sm:$0xff] }
 0x170   :  { %1991 = vmatprep.subr.mxu1 %v2008_v3  ;;  %1949 = vmatpush3.msra.mxu0 %v2192_v53 }
 0x171   :  { %1992 = vmatpush3.msra.mxu1 %v2175_v48  ;;  %1950 = vmatprep.subr.mxu0 %v2008_v3 }
 0x172   :  { %1993 = vmatprep.subr.mxu1 %v2008_v3  ;;  %1951 = vmatpush3.msra.mxu0 %v2205_v57 }
 0x173   :  { %1994 = vmatpush3.msra.mxu1 %v2211_v59  ;;  %1952 = vmatprep.subr.mxu0 %v2008_v3 }
 0x174   :  { %1995 = vmatprep.subr.mxu1 %v2008_v3  ;;  %1953 = vmatpush3.msra.mxu0 %v2233_v2 }
 0x175   :  { %1996 = vmatpush3.msra.mxu1 %v2224_v63  ;;  %1954 = vmatprep.subr.mxu0 %v2008_v3 }
 0x176   :  { %1997 = vmatprep.subr.mxu1 %v2008_v3  ;;  %1955 = vmatpush3.msra.mxu0 %v2252_v19 }
 0x177   :  { %1998 = vmatpush3.msra.mxu1 %v2245_v13  ;;  %1956 = vmatprep.subr.mxu0 %v2008_v3 }
 0x178   :  { %1999 = vmatprep.subr.mxu1 %v2008_v3  ;;  %1957 = vmatpush3.msra.mxu0 %v2272_v39 }
 0x179   :  { %2000 = vmatpush3.msra.mxu1 %v2263_v32  ;;  %2001 = vmatprep.mubr.msk.f32.mxu1 %vm2009_vm0, %v2008_v3 }
 0x17a   :  { %1958 = vmatprep.subr.mxu0 %v2008_v3  ;;  %2002 = vmatmul.mubr.f32.vlgmr.msra.gmra.mxu1 %v2576_v9 }
 0x17b   :  { %1959 = vmatpush3.msra.mxu0 %v2770_v4  ;;  %1966 = vmatprep.mubr.msk.f32.mxu0 %vm2009_vm0, %v2008_v3 }
 0x17c   :  { %1960 = vmatprep.subr.mxu0 %v2008_v3 }
 0x17d   :  { %1961 = vmatpush3.msra.mxu0 %v2771_v5 }
 0x17e   :  { %1962 = vmatprep.subr.mxu0 %v2008_v3 }
 0x17f   :  { %1963 = vmatpush3.msra.mxu0 %v2772_v6 }
 0x180   :  { %1964 = vmatprep.subr.mxu0 %v2008_v3 }
 0x181   :  { %1965 = vmatpush3.msra.mxu0 %v2773_v10 }
 0x182   :  { %1967 = vmatmul.mubr.f32.vlgmr.msra.gmra.mxu0 %v2576_v9 }
 0x1f8   :  { %v915_v11 = vpop.f32.mrf.mxu1 }
 0x1fa   :  { %v1863_v12 = vpop.f32.mrf.mxu1 }
 0x200   :  { %v764_v15 = vpop.f32.mrf.mxu0 }
 0x201   :  { %v765_v22 = vadd.f32 1e-05, %v764_v15 }
 0x202   :  { %v1828_v16 = vpop.f32.mrf.mxu0 }
 0x203   :  { %v916_v24 = vadd.f32 %v915_v11, %v765_v22 }
 0x218   :  { %v1108_v17 = vpop.f32.mrf.mxu1 }
 0x21a   :  { %v1933_v18 = vpop.f32.mrf.mxu1 }
 0x221   :  { %v1019_v20 = vpop.f32.mrf.mxu0 }
 0x222   :  { %v1020_v27 = vadd.f32 %v1019_v20, %v916_v24 }
 0x223   :  { %v1898_v21 = vpop.f32.mrf.mxu0 }
 0x224   :  { %v1109_v28 = vadd.f32 %v1108_v17, %v1020_v27 }
 0x23a   :  { %v1314_v23 = vpop.f32.mrf.mxu1 }
 0x23c   :  { %v2003_v25 = vpop.f32.mrf.mxu1 }
 0x242   :  { %v1227_v29 = vpop.f32.mrf.mxu0 }
 0x243   :  { %v1228_v3 = vadd.f32 %v1227_v29, %v1109_v28 }
 0x244   :  { %v1968_v30 = vpop.f32.mrf.mxu0 }
 0x245   :  { %v1315_v34 = vadd.f32 %v1314_v23, %v1228_v3 }
 0x247   :  { %2006 = vrsqrt.f32 %v1315_v34 }
 0x254   :  { %v2007_v35 = vpop.eup %2006 }
 0x255   :  { %v1319_v43 = vmul.f32 %v2007_v35, %v2572_v58 }
 0x257   :  { %v1327_v46 = vmul.f32 %v1378_v40, %v1319_v43 }
 0x259   :  { %v1335_v47 = vadd.f32 %v1379_v45, %v1327_v46 }
 0x25b   :  { %1336 = vst [vmem:[#allocation2] sm:$0xff] %v1335_v47 }
 0x262   :  { %v1355_v48 = vld [vmem:[#allocation2] sm:$0xf] }
 0x263   :  { %1356 = vst [vmem:[%s2735_s4] sm:$0xf] %v1355_v48 }

</bundles_post_ra>
